<compile_context>
chip_gen: v7x
topology: tpu7x:2x2x1
jax: 0.10.0
libtpu: 0.0.40
codegen_flags: <defaults>
</compile_context>

<pallas_src>
import functools

import jax
import jax.numpy as jnp
from jax.experimental import pallas as pl
from jax.experimental.pallas import tpu as pltpu

MAX_LENGTH = 10


def _decoder_kernel(hid_ref, enc_ref, wh_ref, we_ref, b_ref, o_ref):
    # hid_ref: (TB, H)  bf16    wh_ref: (H, O)  bf16
    # enc_ref: (TB, LH) bf16    we_ref: (LH, O) bf16
    # b_ref:   (1, O)   f32     o_ref:  (TB, O) f32
    # Fused "cat + Linear": x @ W^T == hid @ Wh + enc @ We  (bf16 MXU, f32 acc).
    logits = (
        jnp.dot(hid_ref[...], wh_ref[...], preferred_element_type=jnp.float32)
        + jnp.dot(enc_ref[...], we_ref[...], preferred_element_type=jnp.float32)
        + b_ref[...]
    )
    # LogSoftmax over the full output dim (block carries all of O), in f32.
    m = jnp.max(logits, axis=-1, keepdims=True)
    shifted = logits - m
    lse = jnp.log(jnp.sum(jnp.exp(shifted), axis=-1, keepdims=True))
    o_ref[...] = (shifted - lse).astype(o_ref.dtype)


def prepare_decoder_params(w, b, hidden_size):
    """One-time weight prep (hoisted out of the per-step forward path).

    w: (O, F) PyTorch Linear weight with F = H*(L+1); b: (O,).
    Returns (Wh^T (H,O) bf16, We^T (L*H,O) bf16, bias (1,O) f32).
    """
    wh_t = jnp.transpose(w[:, :hidden_size]).astype(jnp.bfloat16)
    we_t = jnp.transpose(w[:, hidden_size:]).astype(jnp.bfloat16)
    b2d = b.reshape(1, -1).astype(jnp.float32)
    return wh_t, we_t, b2d


@functools.partial(jax.jit, static_argnames=("batch_tile",))
def decoder_no_rnn_forward(hidden, encoder_outputs, wh_t, we_t, b2d,
                           batch_tile=256):
    """
    hidden:          (1, B, H)   (num_layers must be 1)
    encoder_outputs: (B, L, H)   L == max_length
    wh_t, we_t, b2d: prepared once by prepare_decoder_params
    returns:         (B, 1, O) log-probabilities (float32)

    batch_tile: 256 default (multiple of 256 for v6e/v7x MXU fill; 128-multiple
    for v5e).  Sweep 128/256/512 per generation if this path is hot.
    """
    assert hidden.shape[0] == 1, "reshape(B,H) only valid for num_layers == 1"
    assert batch_tile % 8 == 0, "batch tile must be a sublane multiple"
    B, L, H = encoder_outputs.shape
    O = wh_t.shape[1]
    LH = L * H

    # Free, contiguous re-layouts (no data movement) + bf16 cast for the MXU.
    # (Ideally the upstream producer already emits bf16; the cast fuses there.)
    hid2d = hidden.reshape(B, H).astype(jnp.bfloat16)       # (1,B,H)->transpose+squeeze
    enc2d = encoder_outputs.reshape(B, LH).astype(jnp.bfloat16)  # .view(B,1,-1) flat

    # No padding copy: clamp the tile for tiny batches, then let Pallas handle
    # the ragged last block (tail rows never reach the output array).
    tile = min(batch_tile, ((B + 7) // 8) * 8)
    grid = (pl.cdiv(B, tile),)   # >= 2 steps whenever B > tile -> both v7x TCs

    vmem = pltpu.MemorySpace.VMEM
    cost = pl.CostEstimate(
        flops=2 * B * (H + LH) * O + 4 * B * O,          # matmuls + softmax VPU work
        transcendentals=B * (O + 1),                     # exp per element + log per row
        bytes_accessed=(H + LH) * O * 2                  # bf16 weights (resident)
        + B * (H + LH) * 2                               # bf16 activations
        + B * O * 4 + O * 4,                             # f32 output + bias
    )

    out2d = pl.pallas_call(
        _decoder_kernel,
        out_shape=jax.ShapeDtypeStruct((B, O), jnp.float32),
        grid=grid,
        in_specs=[
            pl.BlockSpec((tile, H), lambda i: (i, 0), memory_space=vmem),
            pl.BlockSpec((tile, LH), lambda i: (i, 0), memory_space=vmem),
            # Weights/bias: same block every grid step -> stay VMEM-resident.
            pl.BlockSpec((H, O), lambda i: (0, 0), memory_space=vmem),
            pl.BlockSpec((LH, O), lambda i: (0, 0), memory_space=vmem),
            pl.BlockSpec((1, O), lambda i: (0, 0), memory_space=vmem),
        ],
        out_specs=pl.BlockSpec((tile, O), lambda i: (i, 0), memory_space=vmem),
        compiler_params=pltpu.CompilerParams(
            dimension_semantics=("parallel",),   # shards grid across v7x TCs
        ),
        cost_estimate=cost,
    )(hid2d, enc2d, wh_t, we_t, b2d)

    return out2d.reshape(B, 1, O)


def _reference(hidden, encoder_outputs, w, b):
    B = encoder_outputs.shape[0]
    x = jnp.concatenate(
        (jnp.transpose(hidden, (1, 0, 2)), encoder_outputs.reshape(B, 1, -1)),
        axis=-1,
    )
    logits = jnp.einsum("bsf,of->bso", x, w) + b
    return jax.nn.log_softmax(logits, axis=2)


if __name__ == "__main__":
    hidden_size = 32
    output_size = 128
    max_length = MAX_LENGTH                     # 10
    F_dim = hidden_size * (max_length + 1)      # 352

    key = jax.random.PRNGKey(0)
    k_h, k_e, k_w, k_b, k_h2, k_e2 = jax.random.split(key, 6)

    # PyTorch default Linear init: U(-1/sqrt(F), 1/sqrt(F)).
    bound = 1.0 / (F_dim ** 0.5)
    w = jax.random.uniform(k_w, (output_size, F_dim), minval=-bound, maxval=bound,
                           dtype=jnp.float32)
    b = jax.random.uniform(k_b, (output_size,), minval=-bound, maxval=bound,
                           dtype=jnp.float32)
    # NOTE: self.out Linear in the PyTorch module is unused in forward(); omitted.

    # One-time weight prep (split + transpose + bf16 cast), outside the hot loop.
    wh_t, we_t, b2d = prepare_decoder_params(w, b, hidden_size)

    # ---- Case 1: B=8, single grid step (tile clamps to 8). ----
    B1 = 8
    hidden1 = jax.random.normal(k_h, (1, B1, hidden_size), dtype=jnp.float32)
    enc1 = jax.random.normal(k_e, (B1, max_length, hidden_size), dtype=jnp.float32)
    out1 = jax.block_until_ready(
        decoder_no_rnn_forward(hidden1, enc1, wh_t, we_t, b2d))
    ref1 = _reference(hidden1, enc1, w, b)
    assert out1.shape == (B1, 1, output_size)
    assert jnp.allclose(out1, ref1, atol=3e-2, rtol=0), \
        float(jnp.max(jnp.abs(out1 - ref1)))

    # ---- Case 2: B=20 with batch_tile=8 -> multi-step grid + ragged last block. ----
    B2 = 20
    hidden2 = jax.random.normal(k_h2, (1, B2, hidden_size), dtype=jnp.float32)
    enc2 = jax.random.normal(k_e2, (B2, max_length, hidden_size), dtype=jnp.float32)
    out2 = jax.block_until_ready(
        decoder_no_rnn_forward(hidden2, enc2, wh_t, we_t, b2d, batch_tile=8))
    ref2 = _reference(hidden2, enc2, w, b)
    assert out2.shape == (B2, 1, output_size)
    assert jnp.allclose(out2, ref2, atol=3e-2, rtol=0), \
        float(jnp.max(jnp.abs(out2 - ref2)))

    print("KERNEL_OK")
</pallas_src>

<mosaic_0001>
module attributes {stable_mosaic.version = 11 : i64} {
  func.func @_decoder_kernel(%arg0: i32, %arg1: memref<8x32xbf16, #tpu.memory_space<vmem>>, %arg2: memref<8x320xbf16, #tpu.memory_space<vmem>>, %arg3: memref<32x128xbf16, #tpu.memory_space<vmem>>, %arg4: memref<320x128xbf16, #tpu.memory_space<vmem>>, %arg5: memref<1x128xf32, #tpu.memory_space<vmem>>, %arg6: memref<8x128xf32, #tpu.memory_space<vmem>>) attributes {dimension_semantics = [#tpu.dimension_semantics<parallel>], iteration_bounds = array<i64: 1>, scalar_prefetch = 0 : i64, scratch_operands = 0 : i64, tpu.core_type = #tpu.core_type<tc>, window_params = [{transform_indices = @transform_0, window_bounds = array<i64: 8, 32>}, {transform_indices = @transform_1, window_bounds = array<i64: 8, 320>}, {pipeline_mode = #tpu.pipeline_mode<synchronous>, transform_indices = @transform_2, window_bounds = array<i64: 32, 128>}, {pipeline_mode = #tpu.pipeline_mode<synchronous>, transform_indices = @transform_3, window_bounds = array<i64: 320, 128>}, {pipeline_mode = #tpu.pipeline_mode<synchronous>, transform_indices = @transform_4, window_bounds = array<i64: 1, 128>}, {transform_indices = @transform_5, window_bounds = array<i64: 8, 128>}]} {
    %c0 = arith.constant 0 : index
    %c0_0 = arith.constant 0 : index
    %0 = vector.load %arg1[%c0, %c0_0] : memref<8x32xbf16, #tpu.memory_space<vmem>>, vector<8x32xbf16>
    %c0_1 = arith.constant 0 : index
    %c0_2 = arith.constant 0 : index
    %1 = vector.load %arg3[%c0_1, %c0_2] : memref<32x128xbf16, #tpu.memory_space<vmem>>, vector<32x128xbf16>
    %cst = arith.constant dense<0.000000e+00> : vector<8x128xf32>
    %2 = tpu.matmul %0, %1, %cst {dimension_numbers = #tpu.dot_dimension_numbers<[1], [0], [0], [1], [0, 0, 1, 1], [], []>} : vector<8x32xbf16>, vector<32x128xbf16>, vector<8x128xf32> -> vector<8x128xf32>
    %c0_3 = arith.constant 0 : index
    %c0_4 = arith.constant 0 : index
    %3 = vector.load %arg2[%c0_3, %c0_4] : memref<8x320xbf16, #tpu.memory_space<vmem>>, vector<8x320xbf16>
    %c0_5 = arith.constant 0 : index
    %c0_6 = arith.constant 0 : index
    %4 = vector.load %arg4[%c0_5, %c0_6] : memref<320x128xbf16, #tpu.memory_space<vmem>>, vector<320x128xbf16>
    %cst_7 = arith.constant dense<0.000000e+00> : vector<8x128xf32>
    %5 = tpu.matmul %3, %4, %cst_7 {dimension_numbers = #tpu.dot_dimension_numbers<[1], [0], [0], [1], [0, 0, 1, 1], [], []>} : vector<8x320xbf16>, vector<320x128xbf16>, vector<8x128xf32> -> vector<8x128xf32>
    %6 = arith.addf %2, %5 : vector<8x128xf32>
    %c0_8 = arith.constant 0 : index
    %c0_9 = arith.constant 0 : index
    %7 = vector.load %arg5[%c0_8, %c0_9] : memref<1x128xf32, #tpu.memory_space<vmem>>, vector<1x128xf32>
    %8 = vector.broadcast %7 : vector<1x128xf32> to vector<8x128xf32>
    %9 = arith.addf %6, %8 : vector<8x128xf32>
    %cst_10 = arith.constant dense<0xFF800000> : vector<8xf32>
    %10 = vector.multi_reduction <maximumf>, %9, %cst_10 [1] : vector<8x128xf32> to vector<8xf32>
    %11 = vector.shape_cast %10 : vector<8xf32> to vector<8x1xf32>
    %12 = vector.broadcast %11 : vector<8x1xf32> to vector<8x128xf32>
    %13 = arith.subf %9, %12 : vector<8x128xf32>
    %14 = math.exp %13 : vector<8x128xf32>
    %cst_11 = arith.constant dense<0.000000e+00> : vector<8xf32>
    %15 = vector.multi_reduction <add>, %14, %cst_11 [1] : vector<8x128xf32> to vector<8xf32>
    %16 = vector.shape_cast %15 : vector<8xf32> to vector<8x1xf32>
    %17 = math.log %16 : vector<8x1xf32>
    %18 = vector.broadcast %17 : vector<8x1xf32> to vector<8x128xf32>
    %19 = arith.subf %13, %18 : vector<8x128xf32>
    %c0_12 = arith.constant 0 : index
    %c0_13 = arith.constant 0 : index
    %20 = vector.load %arg6[%c0_12, %c0_13] : memref<8x128xf32, #tpu.memory_space<vmem>>, vector<8x128xf32>
    tpu.vector_store %arg6[%c0_12, %c0_13], %19 {strides = array<i32>} : memref<8x128xf32, #tpu.memory_space<vmem>>, vector<8x128xf32>,
    return
  }
  func.func @transform_0(%arg0: i32) -> (i32, i32) {
    %c0_i32 = arith.constant 0 : i32
    %c0_i32_0 = arith.constant 0 : i32
    return %arg0, %c0_i32 : i32, i32
  }
  func.func @transform_1(%arg0: i32) -> (i32, i32) {
    %c0_i32 = arith.constant 0 : i32
    %c0_i32_0 = arith.constant 0 : i32
    return %arg0, %c0_i32 : i32, i32
  }
  func.func @transform_2(%arg0: i32) -> (i32, i32) {
    %c0_i32 = arith.constant 0 : i32
    %c0_i32_0 = arith.constant 0 : i32
    %c0_i32_1 = arith.constant 0 : i32
    return %c0_i32, %c0_i32_0 : i32, i32
  }
  func.func @transform_3(%arg0: i32) -> (i32, i32) {
    %c0_i32 = arith.constant 0 : i32
    %c0_i32_0 = arith.constant 0 : i32
    %c0_i32_1 = arith.constant 0 : i32
    return %c0_i32, %c0_i32_0 : i32, i32
  }
  func.func @transform_4(%arg0: i32) -> (i32, i32) {
    %c0_i32 = arith.constant 0 : i32
    %c0_i32_0 = arith.constant 0 : i32
    %c0_i32_1 = arith.constant 0 : i32
    return %c0_i32, %c0_i32_0 : i32, i32
  }
  func.func @transform_5(%arg0: i32) -> (i32, i32) {
    %c0_i32 = arith.constant 0 : i32
    %c0_i32_0 = arith.constant 0 : i32
    return %arg0, %c0_i32 : i32, i32
  }
}

</mosaic_0001>

<bundles_post_ra>
// kernel: decoder_no_rnn_forward.1
= control target key start
LH: loop header
LB: loop body
LE: loop exit
PB: predicated region body
PF: predicated region fallthrough
CT: control target
= control target key end

     0   :  { %v506_v2 = vmov 0.0   ;;  %vm507_vm0 = vmmov 0   ;;  %vm199_vm1 = vcmask 523264   ;;  %s631_s0 = inlined_call_operand.vmem [shape: bf16[8,32], index: 0, kind: input, shape index: {}]   ;;  %s632_s1 = inlined_call_operand.vmem [shape: bf16[8,320], index: 1, kind: input, shape index: {}]   ;;  %s633_s2 = inlined_call_operand.vmem [shape: bf16[32,128], index: 2, kind: input, shape index: {}]   ;;  %s634_s3 = inlined_call_operand.vmem [shape: bf16[320,128], index: 3, kind: input, shape index: {}]   ;;  %s635_s4 = inlined_call_operand.vmem [shape: f32[1,128], index: 4, kind: input, shape index: {}]   ;;  %s636_s5 = inlined_call_operand.hbm [shape: f32[8,128], index: 5, kind: output, shape index: {}]  }
   0x1   :  { %v453_v0 = vld [vmem:[%s634_s3 + $0x40] sm:$0xff]   ;;  %430 = vmatprep.subr.bf16.mxu1 %v506_v2  ;;  %v455_v3 = vld [vmem:[%s634_s3 + $0x48] sm:$0xff]   ;;  %438 = vmatprep.mubr.msk.bf16.mxu1 %vm507_vm0, %v506_v2  ;;  %v457_v5 = vld [vmem:[%s634_s3 + $0x50] sm:$0xff]  }
   0x2   :  { %v454_v1 = vld [vmem:[%s634_s3] sm:$0xff]   ;;  %400 = vmatprep.subr.bf16.mxu0 %v453_v0  ;;  %v456_v4 = vld [vmem:[%s634_s3 + $0x8] sm:$0xff]   ;;  %v458_v7 = vld [vmem:[%s634_s3 + $0x10] sm:$0xff]  }
   0x3   :  { %401 = vmatpush3.bf16.msra.mxu0 %v454_v1  ;;  %v459_v6 = vld [vmem:[%s634_s3 + $0x80] sm:$0xff]   ;;  %v460_v8 = vld [vmem:[%s634_s3 + $0x58] sm:$0xff]   ;;  %v462_v9 = vld [vmem:[%s634_s3 + $0x88] sm:$0xff]  }
   0x4   :  { %402 = vmatprep.subr.bf16.mxu0 %v455_v3  ;;  %431 = vmatpush3.bf16.msra.mxu1 %v459_v6  ;;  %v461_v10 = vld [vmem:[%s634_s3 + $0x18] sm:$0xff]   ;;  %v463_v11 = vld [vmem:[%s634_s3 + $0x60] sm:$0xff]   ;;  %v465_v12 = vld [vmem:[%s634_s3 + $0x90] sm:$0xff]  }
   0x5   :  { %432 = vmatprep.subr.bf16.mxu1 %v506_v2  ;;  %v464_v13 = vld [vmem:[%s634_s3 + $0x20] sm:$0xff]   ;;  %v466_v14 = vld [vmem:[%s634_s3 + $0x68] sm:$0xff]   ;;  %v468_v15 = vld [vmem:[%s634_s3 + $0x98] sm:$0xff]  }
   0x6   :  { %v467_v16 = vld [vmem:[%s634_s3 + $0x28] sm:$0xff]   ;;  %v469_v17 = vld [vmem:[%s634_s3 + $0x70] sm:$0xff]   ;;  %v472_v19 = vld [vmem:[%s633_s2] sm:$0xff]  }
   0x7   :  { %403 = vmatpush3.bf16.msra.mxu0 %v456_v4  ;;  %v471_v18 = vld [vmem:[%s632_s1 + $0x8] ss:$0 sps:$4 sm:$0xff]   ;;  %v27_v20 = vld [vmem:[%s632_s1] sm:$0xff]  ;;  %v470_v22 = vld [vmem:[%s634_s3 + $0x30] sm:$0xff]  }
   0x8   :  { %404 = vmatprep.subr.bf16.mxu0 %v457_v5  ;;  %433 = vmatpush3.bf16.msra.mxu1 %v462_v9  ;;  %v373_v21 = vcombine.high %v27_v20, %v27_v20 }
   0x9   :  { %434 = vmatprep.subr.bf16.mxu1 %v506_v2 }
   0xb   :  { %405 = vmatpush3.bf16.msra.mxu0 %v458_v7 }
   0xc   :  { %406 = vmatprep.subr.bf16.mxu0 %v460_v8  ;;  %435 = vmatpush3.bf16.msra.mxu1 %v465_v12 }
   0xd   :  { %436 = vmatprep.subr.bf16.mxu1 %v506_v2 }
   0xf   :  { %407 = vmatpush3.bf16.msra.mxu0 %v461_v10 }
  0x10   :  { %408 = vmatprep.subr.bf16.mxu0 %v463_v11  ;;  %437 = vmatpush3.bf16.msra.mxu1 %v468_v15 }
  0x11   :  { %442 = vmatprep.subr.bf16.mxu1 %v506_v2 }
  0x13   :  { %409 = vmatpush3.bf16.msra.mxu0 %v464_v13  ;;  %439 = vmatmul.mubr.msk.bf16.vlgmr.msra.gmra.mrb[0].mxu1 %vm199_vm1, %v471_v18 }
  0x14   :  { %410 = vmatprep.subr.bf16.mxu0 %v466_v14 }
  0x17   :  { %411 = vmatpush3.bf16.msra.mxu0 %v467_v16 }
  0x18   :  { %10 = vsyncpa [#allocation3], 0  ;;  %412 = vmatprep.subr.bf16.mxu0 %v469_v17  ;;  %443 = vmatpush3.bf16.msra.mxu1 %v472_v19  ;;  %v473_v23 = vld [vmem:[%s634_s3 + $0x78] sm:$0xff]   ;;  %v477_v24 = vld [vmem:[%s633_s2 + $0x8] sm:$0xff]   ;;  %vm295_vm2 = vcmask 261120   ;;  %v372_v27 = vcombine.low %v27_v20, %v27_v20 }
  0x19   :  { %444 = vmatprep.subr.bf16.mxu1 %v506_v2  ;;  %235 = vmatprep.mubr.bf16.mxu0 %v373_v21  ;;  %v474_v25 = vld [vmem:[%s634_s3 + $0x38] sm:$0xff]   ;;  %v22_v26 = vld [vmem:[%s631_s0] sm:$0xf]  ;;  %s508_s3 = smov [#allocation2]  }
  0x1a   :  { %446 = vmatprep.mubr.msk.bf16.mxu1 %vm507_vm0, %v506_v2  ;;  %v399_v42 = vld [vmem:[%s635_s4] ss:$0 sm:$0xff]  ;;  %s364_s17 = sshll.u32 %s508_s3, 4  ;;  %s365_s17 = int_to_ptr.vmem [resolvable:$true] %s364_s17 }
  0x1b   :  { %413 = vmatpush3.bf16.msra.mxu0 %v470_v22  ;;  %s482_s18 = scalar_lea.vmem %s365_s17, 128  ;;  %p487_p1 = scmp.lt.s32.totalorder %s365_s17, %s365_s17 }
  0x1c   :  { %414 = vmatprep.subr.bf16.mxu0 %v473_v23  ;;  %445 = vmatpush3.bf16.msra.mxu1 %v477_v24  ;;  %p483_p0 = scmp.ne.s32.totalorder %s365_s17, %s482_s18  ;;  %p488_p2 = scmp.lt.s32.totalorder %s482_s18, %s482_s18 }
  0x1e   :  { %p489_p3 = por %p488_p2, %p487_p1 }
  0x1f   :  { %415 = vmatpush3.bf16.msra.mxu0 %v474_v25  ;;  %447 = vmatmul.mubr.msk.bf16.vlgmr.msra.gmra.mrb[4].mxu1 %vm295_vm2, %v22_v26 }
  0x20   :  { %p490_p4 = pnand %p489_p3, %p483_p0 }
  0x22   :  { %236 = vmatmul.mubr.bf16.vlgmr.msra.gmra.mrb[0].mxu0 %v372_v27 }
  0xe6   :  { %v277_v28 = vpop.f32.mrb[0].mxu1 }
  0xe7   :  { %v440_v29 = vpop.f32.mrb[1].mxu1 }
  0xe8   :  { %v280_v30 = vpop.f32.mrb[2].mxu1 }
  0xe9   :  { %v441_v31 = vpop.f32.mrb[3].mxu1 }
  0xf2   :  { %v333_v32 = vpop.f32.mrb[4].mxu1 }
  0xf3   :  { %v448_v33 = vpop.f32.mrb[5].mxu1 }
  0xf4   :  { %v336_v34 = vpop.f32.mrb[6].mxu1 }
  0xf5   :  { %v416_v35 = vpop.f32.mrb[0].mxu0  ;;  %v449_v36 = vpop.f32.mrb[7].mxu1 }
  0xf6   :  { %v417_v37 = vpop.f32.mrb[1].mxu0 }
  0xf7   :  { %v418_v38 = vadd.f32 %v417_v37, %v416_v35  ;;  %v419_v39 = vpop.f32.mrb[2].mxu0 }
  0xf8   :  { %v420_v40 = vpop.f32.mrb[3].mxu0 }
  0xf9   :  { %v278_v41 = vadd.f32 %v418_v38, %v277_v28 }
  0xfb   :  { %v334_v43 = vadd.f32 %v333_v32, %v278_v41 }
  0xfd   :  { %v346_v44 = vadd.f32 %v399_v42, %v334_v43 }
  0xff   :  { %347 = vmax.xlane.f32.xlu0 %v346_v44 }
 0x18c   :  { %v348_v45 = vpop.xlane.xlu0 %347 }
 0x18d   :  { %v349_v46 = vsub.f32 %v346_v44, %v348_v45 }
 0x18f   :  { %v350_v47 = vmul.f32 1.442695, %v349_v46 }
 0x191   :  { %478 = vpow2.f32 %v350_v47 }
 0x19b   :  { %v479_v48 = vpop.eup %478 }
 0x19c   :  { %352 = vadd.xlane.f32.xlu0 %v479_v48 }
 0x229   :  { %v353_v49 = vpop.xlane.xlu0 %352 }
 0x22a   :  { %480 = vlog2.f32 %v353_v49 }
 0x234   :  { %v481_v50 = vpop.eup %480 }
 0x235   :  { %v355_v51 = vmul.f32 0.6931472, %v481_v50 }
 0x237   :  { %v356_v52 = vsub.f32 %v349_v46, %v355_v51 }
 0x239   :  { %357 = vst [vmem:[#allocation2] sm:$0xff] %v356_v52 }
 0x23a   :  { %493 = shalt.err (!%p490_p4)
}
 0x23b   :  { %s494_s20 = scalar_lea.hbm %s636_s5, 128 }
 0x23c   :  { %p495_p5 = scmp.ne.s32.totalorder %s636_s5, %s494_s20  ;;  %p498_p6 = scmp.lt.u32.totalorder %s494_s20, %s636_s5 }
 0x23e   :  { %p500_p7 = pnand %p498_p6, %p495_p5 }
 0x240   :  { %503 = shalt.err (!%p500_p7)
}
 0x241   :  { %367 = dma.vmem_to_hbm [thread:$0]  %s365_s17, 128, %s636_s5, [#allocation3]  }
 0x242   :  { %504 = dma.done.wait [#allocation3], 128  }
 0x243   :  { %505 = vsyncadd [#allocation3], 4294967168 }
 0x244   :  { %371 = vsyncpa [#allocation3], 1 }

</bundles_post_ra>
